<compile_context>
chip_gen: v5e
topology: v5e:2x2
jax: 0.10.0
libtpu: 0.0.40
codegen_flags: <defaults>
</compile_context>

<pallas_src>
import jax
import jax.numpy as jnp
from jax.experimental import pallas as pl
from jax.experimental.pallas import tpu as pltpu


def _round_up(x, m):
    return (x + m - 1) // m * m


def _choose_tm(N, E, itemsize, *, target_bytes=3 << 20, min_steps=8):
    """Pick the row-tile: big enough to amortize the ~0.35us per-grid-step
    overhead, small enough to keep the grid pipelined / megacore-shardable
    and the live set comfortably in VMEM (incl. v7x's 64 MiB)."""
    packing = max(8, 32 // max(1, itemsize))          # sublane packing per dtype
    if N <= packing:
        return N                                       # one full-dim block
    tm = max(packing, target_bytes // max(1, E * itemsize))
    # Keep >= min_steps grid steps when there is enough work.
    tm = min(tm, max(packing, _round_up(pl.cdiv(N, min_steps), packing)))
    tm = _round_up(tm, packing)
    if tm >= N:
        return N                                       # full-dim block is always legal
    return tm


def highway_kernel(x_ref, w_ref, b_ref, o_ref):
    # x_ref: (tm, E)  tile of flattened input rows
    # w_ref: (E, 2E)  fused [W_proj^T | W_gate^T], resident (single-buffered)
    # b_ref: (1, 2E)  fused [b_proj | b_gate] in f32
    # o_ref: (tm, E)
    E = o_ref.shape[-1]
    x = x_ref[...]

    # One fused matmul: native-dtype operands, f32 accumulation on the MXU.
    y = jnp.dot(x, w_ref[...], preferred_element_type=jnp.float32) + b_ref[...]

    proj = jnp.maximum(y[:, :E], 0.0)      # relu(proj_layer(x))
    gate = jax.nn.sigmoid(y[:, E:])        # sigmoid(gate_layer(x))

    x_f32 = x.astype(jnp.float32)
    # g*p + (1-g)*x  ==  x + g*(p - x)   (one fewer vmul/vsub per element)
    o_ref[...] = (x_f32 + gate * (proj - x_f32)).astype(o_ref.dtype)


def highway(x, w_proj, b_proj, w_gate, b_gate, *, tm=None):
    """Highway forward.

    x: (L, B, E); w_*: (E, E) in PyTorch layout (out, in); b_*: (E,).
    Returns (L, B, E).
    """
    L, B, E = x.shape
    N = L * B
    x2d = x.reshape(N, E)

    # Fuse the two Linear layers into a single (E, 2E) weight so the kernel
    # issues one wide MXU matmul per tile.  No feature padding and no row
    # padding: avoids extra HBM copies of x / output in this mem-bound kernel.
    w_cat = jnp.concatenate([w_proj.T, w_gate.T], axis=1).astype(x.dtype)    # (E, 2E)
    b_cat = jnp.concatenate([b_proj, b_gate]).astype(jnp.float32).reshape(1, 2 * E)

    itemsize = jnp.dtype(x.dtype).itemsize
    if tm is None:
        tm = _choose_tm(N, E, itemsize)
    grid = (pl.cdiv(N, tm),)          # ragged last row-block handled by Pallas masking

    # Explicit VMEM budget from the live set: double-buffered x/out tiles,
    # single-buffered weight/bias, plus f32 intermediates (y / proj / gate / mix).
    w_bytes = int(w_cat.size) * jnp.dtype(w_cat.dtype).itemsize
    io_bytes = 2 * 2 * tm * E * itemsize
    scratch_bytes = 2 * tm * 2 * E * 4
    vmem_limit = int(min(48 << 20,
                         max(16 << 20,
                             int(1.25 * (w_bytes + b_cat.size * 4
                                         + io_bytes + scratch_bytes)))))

    cost = pl.CostEstimate(
        flops=2 * N * E * (2 * E),
        transcendentals=N * E,
        bytes_accessed=2 * N * E * itemsize + w_bytes + 2 * E * 4,
    )

    out2d = pl.pallas_call(
        highway_kernel,
        out_shape=jax.ShapeDtypeStruct((N, E), x.dtype),
        grid_spec=pltpu.PrefetchScalarGridSpec(
            num_scalar_prefetch=0,
            grid=grid,
            in_specs=[
                pl.BlockSpec((tm, E), lambda i: (i, 0)),              # x row tile
                pl.BlockSpec((E, 2 * E), lambda i: (0, 0),
                             pipeline_mode=pl.Buffered(1)),           # resident fused weights
                pl.BlockSpec((1, 2 * E), lambda i: (0, 0),
                             pipeline_mode=pl.Buffered(1)),           # resident fused biases
            ],
            out_specs=pl.BlockSpec((tm, E), lambda i: (i, 0)),
        ),
        compiler_params=pltpu.CompilerParams(
            dimension_semantics=("parallel",),
            vmem_limit_bytes=vmem_limit),
        cost_estimate=cost,
    )(x2d, w_cat, b_cat)

    return out2d.reshape(L, B, E)


def highway_ref(x, w_proj, b_proj, w_gate, b_gate):
    """Pure-JAX reference matching the PyTorch module."""
    x_proj = jax.nn.relu(jnp.einsum('lbe,oe->lbo', x, w_proj) + b_proj)
    x_gate = jax.nn.sigmoid(jnp.einsum('lbe,oe->lbo', x, w_gate) + b_gate)
    return x_gate * x_proj + (1.0 - x_gate) * x


if __name__ == "__main__":
    key = jax.random.PRNGKey(0)
    L, B, E = 8, 2, 32   # max_sentence_length, batch_size, embed_size

    k1, k2, k3, k4, k5 = jax.random.split(key, 5)
    x = jax.random.normal(k1, (L, B, E), dtype=jnp.float32)
    # PyTorch Linear shapes: weight (out, in), bias (out,).
    bound = 1.0 / (E ** 0.5)
    w_proj = jax.random.uniform(k2, (E, E), jnp.float32, -bound, bound)
    b_proj = jax.random.uniform(k3, (E,), jnp.float32, -bound, bound)
    w_gate = jax.random.uniform(k4, (E, E), jnp.float32, -bound, bound)
    b_gate = jax.random.uniform(k5, (E,), jnp.float32, -bound, bound)

    out = highway(x, w_proj, b_proj, w_gate, b_gate)
    out = jax.block_until_ready(out)

    ref = highway_ref(x, w_proj, b_proj, w_gate, b_gate)
    assert out.shape == (L, B, E)
    assert jnp.allclose(out, ref, atol=1e-5, rtol=1e-5), "mismatch vs reference"

    print("KERNEL_OK")
</pallas_src>

<mosaic_0001>
module attributes {stable_mosaic.version = 11 : i64} {
  func.func @highway_kernel(%arg0: i32, %arg1: memref<8x32xf32, #tpu.memory_space<vmem>>, %arg2: memref<32x64xf32, #tpu.memory_space<vmem>>, %arg3: memref<1x64xf32, #tpu.memory_space<vmem>>, %arg4: memref<8x32xf32, #tpu.memory_space<vmem>>) attributes {dimension_semantics = [#tpu.dimension_semantics<parallel>], iteration_bounds = array<i64: 2>, scalar_prefetch = 0 : i64, scratch_operands = 0 : i64, tpu.core_type = #tpu.core_type<tc>, window_params = [{transform_indices = @transform_0, window_bounds = array<i64: 8, 32>}, {pipeline_mode = #tpu.pipeline_mode<synchronous>, transform_indices = @transform_1, window_bounds = array<i64: 32, 64>}, {pipeline_mode = #tpu.pipeline_mode<synchronous>, transform_indices = @transform_2, window_bounds = array<i64: 1, 64>}, {transform_indices = @transform_3, window_bounds = array<i64: 8, 32>}]} {
    %c0 = arith.constant 0 : index
    %c0_0 = arith.constant 0 : index
    %0 = vector.load %arg1[%c0, %c0_0] : memref<8x32xf32, #tpu.memory_space<vmem>>, vector<8x32xf32>
    %c0_1 = arith.constant 0 : index
    %c0_2 = arith.constant 0 : index
    %1 = vector.load %arg2[%c0_1, %c0_2] : memref<32x64xf32, #tpu.memory_space<vmem>>, vector<32x64xf32>
    %cst = arith.constant dense<0.000000e+00> : vector<8x64xf32>
    %2 = tpu.matmul %0, %1, %cst {dimension_numbers = #tpu.dot_dimension_numbers<[1], [0], [0], [1], [0, 0, 1, 1], [], []>} : vector<8x32xf32>, vector<32x64xf32>, vector<8x64xf32> -> vector<8x64xf32>
    %c0_3 = arith.constant 0 : index
    %c0_4 = arith.constant 0 : index
    %3 = vector.load %arg3[%c0_3, %c0_4] : memref<1x64xf32, #tpu.memory_space<vmem>>, vector<1x64xf32>
    %4 = vector.broadcast %3 : vector<1x64xf32> to vector<8x64xf32>
    %5 = arith.addf %2, %4 : vector<8x64xf32>
    %6 = vector.extract_strided_slice %5 {offsets = [0, 0], sizes = [8, 32], strides = [1, 1]} : vector<8x64xf32> to vector<8x32xf32>
    %cst_5 = arith.constant 0.000000e+00 : f32
    %7 = vector.broadcast %cst_5 : f32 to vector<8x32xf32>
    %8 = arith.maximumf %6, %7 : vector<8x32xf32>
    %9 = vector.extract_strided_slice %5 {offsets = [0, 32], sizes = [8, 32], strides = [1, 1]} : vector<8x64xf32> to vector<8x32xf32>
    %10 = arith.negf %9 : vector<8x32xf32>
    %11 = math.exp %10 : vector<8x32xf32>
    %cst_6 = arith.constant 1.000000e+00 : f32
    %12 = vector.broadcast %cst_6 : f32 to vector<8x32xf32>
    %13 = arith.addf %12, %11 : vector<8x32xf32>
    %14 = arith.divf %12, %13 : vector<8x32xf32>
    %15 = arith.subf %8, %0 : vector<8x32xf32>
    %16 = arith.mulf %14, %15 : vector<8x32xf32>
    %17 = arith.addf %0, %16 : vector<8x32xf32>
    %c0_7 = arith.constant 0 : index
    %c0_8 = arith.constant 0 : index
    %18 = vector.load %arg4[%c0_7, %c0_8] : memref<8x32xf32, #tpu.memory_space<vmem>>, vector<8x32xf32>
    tpu.vector_store %arg4[%c0_7, %c0_8], %17 {strides = array<i32>} : memref<8x32xf32, #tpu.memory_space<vmem>>, vector<8x32xf32>,
    return
  }
  func.func @transform_0(%arg0: i32) -> (i32, i32) {
    %c0_i32 = arith.constant 0 : i32
    %c0_i32_0 = arith.constant 0 : i32
    return %arg0, %c0_i32 : i32, i32
  }
  func.func @transform_1(%arg0: i32) -> (i32, i32) {
    %c0_i32 = arith.constant 0 : i32
    %c0_i32_0 = arith.constant 0 : i32
    %c0_i32_1 = arith.constant 0 : i32
    return %c0_i32, %c0_i32_0 : i32, i32
  }
  func.func @transform_2(%arg0: i32) -> (i32, i32) {
    %c0_i32 = arith.constant 0 : i32
    %c0_i32_0 = arith.constant 0 : i32
    %c0_i32_1 = arith.constant 0 : i32
    return %c0_i32, %c0_i32_0 : i32, i32
  }
  func.func @transform_3(%arg0: i32) -> (i32, i32) {
    %c0_i32 = arith.constant 0 : i32
    %c0_i32_0 = arith.constant 0 : i32
    return %arg0, %c0_i32 : i32, i32
  }
}

</mosaic_0001>

<bundles_post_ra>
// kernel: tpu_custom_call.1
= control target key start
LH: loop header
LB: loop body
LE: loop exit
PB: predicated region body
PF: predicated region fallthrough
CT: control target
= control target key end

     0   :  { %8 = vsyncpa [#allocation3], 0  ;;  %s750_s0 = inlined_call_operand.hbm [shape: f32[16,32], index: 0, kind: input, shape index: {}]   ;;  %s751_s1 = inlined_call_operand.hbm [shape: f32[32,64], index: 1, kind: input, shape index: {}]   ;;  %s752_s2 = inlined_call_operand.vmem [shape: f32[1,64], index: 2, kind: input, shape index: {}]   ;;  %s753_s3 = inlined_call_operand.hbm [shape: f32[16,32], index: 3, kind: output, shape index: {}]  }
   0x1   :  { %10 = vsyncpa [#allocation3 + $0x1], 0 }
   0x2   :  { %11 = vsyncpa [#allocation6], 0 }
   0x3   :  { %12 = vsyncpa [#allocation4], 0 }
   0x4   :  { %14 = vsyncpa [#allocation4 + $0x1], 0  ;;  %s605_s12 = smov 0   ;;  %s607_s13 = smov 0  }
   0x5   :  { %s609_s14 = smov 0   ;;  %s611_s15 = smov 0  }
   0x6 LB: > { %s130_s18 = sshll.u32 %s751_s1, 4  ;;  %s629_s19 = sadd.s32 4294967295, %s578_s15   ;;  %s578_s15 = sphi %s611_s15, %s763_s15   ;;  %s574_s14 = sphi %s609_s14, %s762_s14   ;;  %s570_s13 = sphi %s607_s13, %s761_s13   ;;  %s566_s12 = sphi %s605_s12, %s760_s12   ;;  %s131_s18 = int_to_ptr.hbm [resolvable:$true] %s130_s18 }
   0x7   : > { %p367_p0 = scmp.ge.s32.totalorder %s578_s15, 1  ;;  %p41_p1 = scmp.eq.s32.totalorder %s629_s19, 0 }
   0x8   : > { %p119_p2 = scmp.lt.s32.totalorder %s578_s15, 3  ;;  %s580_s21 = smov [#allocation5]  }
   0x9   : > { %s132_s22 = sshll.u32 %s580_s21, 4  ;;  %s581_s23 = smov 128   ;;  %s133_s22 = int_to_ptr.vmem [resolvable:$true] %s132_s22 }
   0xa   : > { %p634_p3 = pnand %p367_p0, %p119_p2  ;;  %s582_s24 = smov 8  }
   0xb   : > { %s366_s25 = sadd.s32 4294967294, %s578_s15   ;;  %s645_s26 = sadd.s32 1, %s578_s15  }
   0xc   : > { %p390_p4 = pneg %p634_p3  ;;  %s27_s27 = sadd.s32 1, %s574_s14 }
   0xd   : > { %s24_s28 = ssub.s32 %s578_s15, %s645_s26  ;;  %p34_p7 = scmp.ne.s32.totalorder %s574_s14, %s570_s13 }
   0xe   : > { %p391_p6 = pnand %p390_p4, %p41_p1  ;;  %p25_p8 = scmp.eq.s32.totalorder %s24_s28, 0 }
   0xf   : > { %p35_p9 = scmp.eq.s32.totalorder %s578_s15, 0  ;;  %p40_p10 = scmp.ne.s32.totalorder %s570_s13, %s566_s12 }
  0x10   : > { %393 = dma.hbm_to_vmem [thread:$0]  (!%p391_p6), %s131_s18, 512, %s133_s22, [#allocation6], %s581_s23, %s581_s23, %s582_s24  }
  0x11   : > { %p106_p11 = scmp.eq.s32.totalorder %s629_s19, 1  ;;  %p661_p12 = por %p41_p1, %p40_p10 }
  0x12   : > { %s657_s29 = scalar_select %p25_p8, %s574_s14, %s27_s27  }
  0x13   : > { %p665_p13 = por %p106_p11, %p34_p7  ;;  %p112_p0 = scmp.eq.s32.totalorder %s366_s25, 1 }
  0x14   : > { %p36_p2 = por %p35_p9, %p34_p7  ;;  %s149_s5 = sand.u32 1, %s574_s14  }
  0x15   : > { %p670_p4 = por %p112_p0, %p40_p10  ;;  %p403_p6 = scmp.lt.s32.totalorder %s578_s15, 2 }
  0x16   : > { %s370_s7 = sshll.u32 %s149_s5, 3  ;;  %s371_s8 = sshll.u32 %s578_s15, 3 }
  0x17   : > { %s157_s11 = scalar_lea.hbm %s750_s0, %s371_s8  ;;  %s153_s17 = scalar_lea.vmem [#allocation2], %s370_s7 }
  0x18   : > { %s159_s16 = sshll.u32 %s157_s11, 4  ;;  %s161_s18 = sshll.u32 %s153_s17, 4  ;;  %s160_s16 = int_to_ptr.hbm [resolvable:$true] %s159_s16  ;;  %s162_s18 = int_to_ptr.vmem [resolvable:$true] %s161_s18 }
  0x19   : > { %p679_p8 = pnand %p403_p6, %p36_p2  ;;  %s150_s22 = scalar_lea.sflag [#allocation3], %s149_s5 }
  0x1a   : > { %s478_s23 = sshra.s32 %s160_s16, 4  ;;  %s485_s28 = scalar_lea.hbm %s750_s0, 16  ;;  %s479_s23 = int_to_ptr.hbm [resolvable:$true] %s478_s23 }
  0x1b   : > { %s480_s24 = scalar_lea.hbm %s479_s23, 8  ;;  %p482_p9 = pneg %p679_p8 }
  0x1c   : > { %p481_p7 = scmp.ne.s32.totalorder %s479_s23, %s480_s24  ;;  %p486_p0 = scmp.lt.s32.totalorder %s479_s23, %s750_s0 }
  0x1d   : > { %p487_p2 = scmp.lt.s32.totalorder %s485_s28, %s480_s24 }
  0x1e   : > { %p483_p10 = pnand %p482_p9, %p481_p7 }
  0x1f   : > { %p488_p6 = por %p487_p2, %p486_p0 }
  0x20   : > { %p484_p11 = pneg %p483_p10 }
  0x22   : > { %p489_p5 = pnand %p488_p6, %p484_p11 }
  0x24   : > { %492 = shalt.err (!%p489_p5)
}
  0x25   : > { %397 = dma.hbm_to_vmem [thread:$0]  (!%p679_p8), %s160_s16, 128, %s162_s18, %s150_s22  }
  0x26   : > { %170 = sbr.rel (%p634_p3) target bundleno = 423 (0x1a7), region = 32  ;;  %s696_s5 = sand.u32 (!%p634_p3), 1, %s570_s13  }
  0x27   : > { %s373_s9 = sshll.u32 (!%p634_p3), %s696_s5, 3  ;;  %s173_s10 = scalar_lea.sflag (!%p634_p3), [#allocation3], %s696_s5 }
  0x28   : > { %s176_s11 = scalar_lea.vmem (!%p634_p3), [#allocation2], %s373_s9 }
  0x2b   : > { %553 = dma.done.wait (%p661_p12), %s173_s10, 128  }
  0x2c   : > { %555 = vsyncadd (%p661_p12), %s173_s10, 4294967168 }
  0x2d   : > { %557 = dma.done.wait (%p41_p1), [#allocation6], 512  }
  0x2e   : > { %559 = vsyncadd (%p41_p1), [#allocation6], 4294966784  ;;  %v209_v0 = vld [vmem:[#allocation5 + $0x18] sm:$0xff]  ;;  %v208_v1 = vld [vmem:[#allocation5 + $0x10] sm:$0xff]  ;;  %vm214_vm0 = vcmask 261120   ;;  %s583_s16 = smov 32  }
  0x2f   : > { %230 = vmatpush.msra.mxu0 %v209_v0  ;;  %v207_v2 = vld [vmem:[#allocation5 + $0x8] sm:$0xff]  ;;  %v206_v3 = vld [vmem:[#allocation5] sm:$0xff]  ;;  %v205_v4 = vld [vmem:[%s176_s11] sm:$0xff]  ;;  %s584_s17 = smov 96   ;;  %s379_s18 = sshll.u32 %s629_s19, 3 }
  0x30   : > { %v443_v5 = vld [vmem:[%s752_s2] ss:$0 sm:$0xff]  ;;  %s281_s23 = scalar_lea.hbm %s753_s3, %s379_s18  ;;  %s204_s24 = scalar_lea.vmem [#allocation7], %s373_s9 }
  0x31   : > { %231 = vmatpush.msra.mxu0 %v208_v1  ;;  %s283_s25 = sshll.u32 %s204_s24, 4  ;;  %s285_s27 = sshll.u32 %s281_s23, 4  ;;  %s284_s25 = int_to_ptr.vmem [resolvable:$true] %s283_s25  ;;  %s286_s27 = int_to_ptr.hbm [resolvable:$true] %s285_s27 }
  0x32   : > { %s271_s28 = scalar_lea.sflag [#allocation4], %s696_s5  ;;  %s522_s7 = sshra.s32 %s286_s27, 4  ;;  %s523_s7 = int_to_ptr.hbm [resolvable:$true] %s522_s7 }
  0x33   : > { %232 = vmatpush.msra.mxu0 %v207_v2  ;;  %s524_s8 = scalar_lea.hbm %s523_s7, 8  ;;  %s528_s9 = scalar_lea.hbm %s753_s3, 16 }
  0x34   : > { %p525_p1 = scmp.ne.s32.totalorder %s523_s7, %s524_s8  ;;  %p529_p12 = scmp.lt.s32.totalorder %s523_s7, %s753_s3 }
  0x35   : > { %233 = vmatpush.msra.mxu0 %v206_v3  ;;  %p530_p8 = scmp.lt.s32.totalorder %s528_s9, %s524_s8 }
  0x36   : > { %376 = vmatmul.msk.f32.vlgmr.msra.gmra.mxu0 %vm214_vm0, %v205_v4  ;;  %p526_p3 = pnand %p525_p1, %p665_p13 }
  0x37   : > { %p531_p7 = por %p530_p8, %p529_p12 }
  0x38   : > { %p527_p5 = pneg %p526_p3 }
  0x3a   : > { %p532_p9 = pnand %p531_p7, %p527_p5 }
  0xb3   : > { %v235_v6 = vpop.f32.mrf.mxu0 }
  0xb4   : > { %v236_v7 = vadd.f32 %v443_v5, %v235_v6 }
  0xb6   : > { %v238_v8 = vmax.f32 %v236_v7, 0.0  ;;  %v377_v10 = vmul.f32 -1.442695, %v236_v7 }
  0xb8   : > { %v258_v9 = vsub.f32 %v238_v8, %v205_v4  ;;  %444 = vpow2.f32 %v377_v10 }
  0xba   : > { %260 = vrot.lane.b32.xlu0 %v258_v9, %s583_s16 }
  0xbe   : > { %v445_v11 = vpop.eup %444 }
  0xbf   : > { %v242_v12 = vadd.f32 1.0, %v445_v11 }
  0xc1   : > { %446 = vrcp.f32 %v242_v12  ;;  %v254_v18 = vand.u32 2147483648, %v242_v12  ;;  %vm248_vm2 = vweird.f32 %v242_v12  ;;  %v252_v19 = vand.u32 2147483647, %v242_v12 }
  0xc3   : > { %v255_v21 = vor.u32 1.1754944e-38, %v254_v18  ;;  %vm253_vm4 = vcmp.eq.f32.partialorder %v252_v19, 8.507059e+37 }
  0xc7   : > { %v447_v13 = vpop.eup %446 }
  0xc8   : > { %v244_v14 = vmul.f32 %v447_v13, %v242_v12  ;;  %vm249_vm1 = vweird.f32 %v447_v13 }
  0xc9   : > { %vm250_vm3 = vmor %vm248_vm2, %vm249_vm1 }
  0xca   : > { %v245_v15 = vsub.f32 1.0, %v244_v14 }
  0xcc   : > { %v246_v16 = vmul.f32 %v447_v13, %v245_v15 }
  0xce   : > { %v247_v17 = vadd.f32 %v447_v13, %v246_v16 }
  0xd0   : > { %v251_v20 = vsel %vm250_vm3, %v447_v13, %v247_v17 }
  0xd1   : > { %v256_v22 = vsel %vm253_vm4, %v255_v21, %v251_v20 }
 0x12c   : > { %v261_v23 = vpop.permute.xlu0 %260 }
 0x12d   : > { %v263_v24 = vmul.f32 %v261_v23, %v256_v22 }
 0x12f   : > { %265 = vrot.lane.b32.xlu0 %v263_v24, %s584_s17 }
 0x1a1   : > { %v266_v25 = vpop.permute.xlu0 %265 }
 0x1a2   : > { %v268_v26 = vadd.f32 %v266_v25, %v205_v4 }
 0x1a4   : > { %269 = vst.msk [vmem:[%s204_s24] sm:$0xff] %vm214_vm0, %v268_v26 }
 0x1a5   : > { %535 = shalt.err (!%p532_p9)
}
 0x1a6   : > { %388 = dma.vmem_to_hbm [thread:$0]  (%p665_p13), %s284_s25, 128, %s286_s27, %s271_s28  }
 0x1a7 PF: > { %s297_s5 = sand.u32 1, %s566_s12   ;;  %p759_p10 = scmp.ge.s32.totalorder %s578_s15, 2 }
 0x1a8   : > { %s298_s30 = scalar_lea.sflag [#allocation4], %s297_s5 }
 0x1a9   : > { %p399_p11 = pnand %p759_p10, %p670_p4 }
 0x1ab   : > { %p400_p0 = pneg %p399_p11 }
 0x1ad   : > { %561 = dma.done.wait (%p400_p0), %s298_s30, 128  }
 0x1ae   : > { %563 = vsyncadd (%p400_p0), %s298_s30, 4294967168  ;;  %p17_p2 = scmp.ge.s32.totalorder %s645_s26, 4   ;;  %s760_s12 = smov %s570_s13 }
 0x1af   : > { %s761_s13 = smov %s574_s14  ;;  %s762_s14 = smov %s657_s29 }
 0x1b0   : > { %s763_s15 = smov %s645_s26  ;;  %19 = sbr.rel (!%p17_p2) target bundleno = 6 (0x6), region = 81 }
 0x1b5   :  { %304 = vsyncpa [#allocation3], 1 }
 0x1b6   :  { %306 = vsyncpa [#allocation3 + $0x1], 1 }
 0x1b7   :  { %307 = vsyncpa [#allocation6], 1 }
 0x1b8   :  { %308 = vsyncpa [#allocation4], 1 }
 0x1b9   :  { %310 = vsyncpa [#allocation4 + $0x1], 1 }

</bundles_post_ra>
